<compile_context>
chip_gen: v6e
topology: v6e:2x2x1
jax: 0.10.0
libtpu: 0.0.40
codegen_flags: <defaults>
</compile_context>

<pallas_src>
import functools
import math

import jax
import jax.numpy as jnp
from jax.experimental import pallas as pl
from jax.experimental.pallas import tpu as pltpu


# ----------------------------- kernels --------------------------------------

def _bias_kernel(x_ref, b_ref, o_ref):
    # x: (tile_n, D'); b: (1, D') broadcast over rows
    o_ref[...] = (x_ref[...] + b_ref[...]).astype(o_ref.dtype)


def _scale_kernel(x_ref, s_ref, o_ref):
    o_ref[...] = (x_ref[...] * s_ref[...]).astype(o_ref.dtype)


def _scale_bias_kernel(x_ref, s_ref, b_ref, o_ref):
    o_ref[...] = (x_ref[...] * s_ref[...] + b_ref[...]).astype(o_ref.dtype)


# --------------------------- wrapper helpers ---------------------------------

def _lane_densify(x, params):
    """Reshape (N, D) -> (N/k, k*D) so the last dim is a multiple of 128,
    tiling the [1, D] params k times.  Falls back to the original layout if
    N is not divisible by k."""
    N, D = x.shape
    if D % 128 == 0:
        return x, params, N, D
    k = 128 // math.gcd(D, 128)
    if k > 1 and N % k == 0:
        x2 = x.reshape(N // k, k * D)
        params2 = [jnp.tile(p, (1, k)) for p in params]
        return x2, params2, N // k, k * D
    return x, params, N, D


def _choose_tile_n(n_rows, row_bytes, itemsize):
    """Pick a row tile: multiple of the sublane quantum, VMEM-budgeted
    (~2 MiB per buffer -> ~8 MiB for in+out double buffers, safe on all
    of v5e/v6e/v7x default scoped limits), and leaving >=2 grid steps when
    possible so v7x can shard across both TensorCores."""
    sub = {4: 8, 2: 16, 1: 32}.get(itemsize, 8)
    if n_rows <= sub:
        return n_rows                      # full-extent block
    per_buf_budget = 2 * 1024 * 1024       # bytes per (double-buffered) buffer
    t = max(sub, (per_buf_budget // max(row_bytes, 1)) // sub * sub)
    half = -(-n_rows // 2)                 # ceil(n_rows / 2)
    half = -(-half // sub) * sub           # round up to sublane quantum
    t = min(t, half)
    rows_padded = -(-n_rows // sub) * sub
    return min(t, rows_padded)


def node_prompt_forward(x, value, b, fixed_b, *, mode: str = "add",
                        enable_ssf: bool = False):
    """x: [N, D]; value/b/fixed_b: [1, D].  Returns x transformed per mode."""
    assert x.ndim == 2
    N, D = x.shape
    assert value.shape == (1, D) and b.shape == (1, D) and fixed_b.shape == (1, D)

    # Static mode -> prune unused parameter streams; fold (b - fixed_b) once.
    if mode == "add":
        bias = (b - fixed_b) if enable_ssf else b
        kernel, params = _bias_kernel, [bias]
    elif mode == "batch_add":
        # TODO(synk): batch_b is b repeated N times at creation; after per-row
        # batch_b updates via .step() this collapse to x + b is no longer exact.
        kernel, params = _bias_kernel, [b]
    elif mode == "mul":
        kernel, params = _scale_kernel, [value]
    elif mode == "mul_add":
        kernel, params = _scale_bias_kernel, [value, b]
    else:
        raise ValueError(f"unknown mode {mode!r}")

    # Lane-dense layout + VMEM-sized row tile.
    x2, params2, N2, D2 = _lane_densify(x, params)
    itemsize = jnp.dtype(x2.dtype).itemsize
    row_bytes = D2 * itemsize
    tile_n = _choose_tile_n(N2, row_bytes, itemsize)
    grid_n = pl.cdiv(N2, tile_n)

    in_specs = [pl.BlockSpec((tile_n, D2), lambda i: (i, 0))]
    in_specs += [pl.BlockSpec((1, D2), lambda i: (0, 0)) for _ in params2]

    out = pl.pallas_call(
        kernel,
        out_shape=jax.ShapeDtypeStruct((N2, D2), x.dtype),
        grid_spec=pltpu.PrefetchScalarGridSpec(
            num_scalar_prefetch=0,
            grid=(grid_n,),
            in_specs=in_specs,
            out_specs=pl.BlockSpec((tile_n, D2), lambda i: (i, 0)),
        ),
        compiler_params=pltpu.CompilerParams(
            dimension_semantics=("parallel",)),
    )(x2, *params2)

    return out.reshape(N, D)


# ------------------------------ module port ----------------------------------

class NodePromptV2:
    """JAX/Pallas port of NodePrompt_v2 (forward pass only)."""

    def __init__(self, size: int = 300, mode: str = "add",
                 enable_ssf: bool = False, key=None):
        self.size = size
        self.mode = mode
        self.enable_ssf = enable_ssf
        if key is None:
            key = jax.random.PRNGKey(0)
        k_v, k_b = jax.random.split(key)
        # matches nn.init.normal_(value, mean=1, std=0.02); normal_(b, std=0.02)
        self.value = 1.0 + 0.02 * jax.random.normal(k_v, (1, size), jnp.float32)
        self.b = 0.02 * jax.random.normal(k_b, (1, size), jnp.float32)
        # detached copies (frozen) — kept as separate arrays
        self.fixed_value = jnp.array(self.value)
        self.fixed_b = jnp.array(self.b)

    def __call__(self, x):
        return node_prompt_forward(
            x, self.value, self.b, self.fixed_b,
            mode=self.mode, enable_ssf=self.enable_ssf)


# ------------------------------ reference ------------------------------------

def _ref_forward(x, value, b, fixed_b, mode, enable_ssf):
    if mode == "add":
        return x + b - fixed_b if enable_ssf else x + b
    if mode == "mul":
        return x * value
    if mode == "mul_add":
        return x * value + b
    if mode == "batch_add":
        return x + b
    raise ValueError


if __name__ == "__main__":
    key = jax.random.PRNGKey(0)
    k_x, k_p = jax.random.split(key)

    ok = True
    # (N, D) test shapes:
    #   (8, 32)   : lane-densified to (2, 128)
    #   (64, 300) : lane-densified to (2, 9600), two grid steps
    #   (8, 300)  : non-densifiable fallback path (masked-store tail)
    for (N, D) in ((8, 32), (64, 300), (8, 300)):
        x = jax.random.normal(k_x, (N, D), jnp.float32)
        for mode in ("add", "mul", "mul_add", "batch_add"):
            for ssf in (False, True):
                mod = NodePromptV2(size=D, mode=mode, enable_ssf=ssf, key=k_p)
                out = mod(x)
                jax.block_until_ready(out)
                ref = _ref_forward(x, mod.value, mod.b, mod.fixed_b, mode, ssf)
                if not jnp.allclose(out, ref, atol=1e-6, rtol=1e-6):
                    ok = False
                    print(f"MISMATCH shape=({N},{D}) mode={mode} ssf={ssf}")

    if ok:
        print("KERNEL_OK")
</pallas_src>

<mosaic_0001>
module attributes {stable_mosaic.version = 11 : i64} {
  func.func @_bias_kernel(%arg0: i32, %arg1: memref<2x128xf32, #tpu.memory_space<vmem>>, %arg2: memref<1x128xf32, #tpu.memory_space<vmem>>, %arg3: memref<2x128xf32, #tpu.memory_space<vmem>>) attributes {dimension_semantics = [#tpu.dimension_semantics<parallel>], iteration_bounds = array<i64: 1>, scalar_prefetch = 0 : i64, scratch_operands = 0 : i64, tpu.core_type = #tpu.core_type<tc>, window_params = [{transform_indices = @transform_0, window_bounds = array<i64: 2, 128>}, {pipeline_mode = #tpu.pipeline_mode<synchronous>, transform_indices = @transform_1, window_bounds = array<i64: 1, 128>}, {transform_indices = @transform_2, window_bounds = array<i64: 2, 128>}]} {
    %c0 = arith.constant 0 : index
    %c0_0 = arith.constant 0 : index
    %0 = vector.load %arg1[%c0, %c0_0] : memref<2x128xf32, #tpu.memory_space<vmem>>, vector<2x128xf32>
    %c0_1 = arith.constant 0 : index
    %c0_2 = arith.constant 0 : index
    %1 = vector.load %arg2[%c0_1, %c0_2] : memref<1x128xf32, #tpu.memory_space<vmem>>, vector<1x128xf32>
    %2 = vector.broadcast %1 : vector<1x128xf32> to vector<2x128xf32>
    %3 = arith.addf %0, %2 : vector<2x128xf32>
    %c0_3 = arith.constant 0 : index
    %c0_4 = arith.constant 0 : index
    %4 = vector.load %arg3[%c0_3, %c0_4] : memref<2x128xf32, #tpu.memory_space<vmem>>, vector<2x128xf32>
    tpu.vector_store %arg3[%c0_3, %c0_4], %3 {strides = array<i32>} : memref<2x128xf32, #tpu.memory_space<vmem>>, vector<2x128xf32>,
    return
  }
  func.func @transform_0(%arg0: i32) -> (i32, i32) {
    %c0_i32 = arith.constant 0 : i32
    %c0_i32_0 = arith.constant 0 : i32
    return %arg0, %c0_i32 : i32, i32
  }
  func.func @transform_1(%arg0: i32) -> (i32, i32) {
    %c0_i32 = arith.constant 0 : i32
    %c0_i32_0 = arith.constant 0 : i32
    %c0_i32_1 = arith.constant 0 : i32
    return %c0_i32, %c0_i32_0 : i32, i32
  }
  func.func @transform_2(%arg0: i32) -> (i32, i32) {
    %c0_i32 = arith.constant 0 : i32
    %c0_i32_0 = arith.constant 0 : i32
    return %arg0, %c0_i32 : i32, i32
  }
}

</mosaic_0001>

<bundles_post_ra>
// kernel: tpu_custom_call.1
= control target key start
LH: loop header
LB: loop body
LE: loop exit
PB: predicated region body
PF: predicated region fallthrough
CT: control target
= control target key end

     0   :  { %7 = vsyncpa [#allocation3], 0  ;;  %s122_s0 = inlined_call_operand.hbm [shape: f32[2,128], index: 0, kind: input, shape index: {}]   ;;  %s123_s1 = inlined_call_operand.vmem [shape: f32[1,128], index: 1, kind: input, shape index: {}]   ;;  %s124_s2 = inlined_call_operand.hbm [shape: f32[2,128], index: 2, kind: output, shape index: {}]  }
   0x1   :  { %8 = vsyncpa [#allocation4], 0  ;;  %s96_s9 = smov [#allocation2]  }
   0x2   :  { %s15_s10 = sshll.u32 %s96_s9, 4  ;;  %s16_s10 = int_to_ptr.vmem [resolvable:$true] %s15_s10 }
   0x3   :  { %s60_s11 = scalar_lea.vmem %s16_s10, 32  ;;  %p65_p1 = scmp.lt.s32.totalorder %s16_s10, %s16_s10 }
   0x4   :  { %p61_p0 = scmp.ne.s32.totalorder %s16_s10, %s60_s11  ;;  %p66_p2 = scmp.lt.s32.totalorder %s60_s11, %s60_s11 }
   0x6   :  { %p67_p3 = por %p66_p2, %p65_p1 }
   0x8   :  { %p68_p4 = pnand %p67_p3, %p61_p0 }
   0xa   :  { %71 = shalt.err (!%p68_p4)
}
   0xb   :  { %18 = dma.hbm_to_vmem [thread:$0]  %s122_s0, 32, %s16_s10, [#allocation3]  }
   0xc   :  { %92 = dma.done.wait [#allocation3], 32  }
   0xd   :  { %93 = vsyncadd [#allocation3], 4294967264  ;;  %s97_s14 = smov [#allocation5]   ;;  %v24_v0 = vld [vmem:[#allocation2] sm:$0x3] }
   0xe   :  { %s40_s15 = sshll.u32 %s97_s14, 4  ;;  %v49_v1 = vld [vmem:[%s123_s1] ss:$0 sm:$0xff]  ;;  %s41_s15 = int_to_ptr.vmem [resolvable:$true] %s40_s15 }
   0xf   :  { %v32_v2 = vadd.f32 %v49_v1, %v24_v0  ;;  %s72_s18 = scalar_lea.vmem %s41_s15, 32  ;;  %p77_p6 = scmp.lt.s32.totalorder %s41_s15, %s41_s15 }
  0x10   :  { %p73_p5 = scmp.ne.s32.totalorder %s41_s15, %s72_s18  ;;  %p78_p7 = scmp.lt.s32.totalorder %s72_s18, %s72_s18 }
  0x11   :  { %33 = vst [vmem:[#allocation5] sm:$0x3] %v32_v2 }
  0x12   :  { %p79_p8 = por %p78_p7, %p77_p6 }
  0x14   :  { %p80_p9 = pnand %p79_p8, %p73_p5 }
  0x16   :  { %83 = shalt.err (!%p80_p9)
}
  0x17   :  { %43 = dma.vmem_to_hbm [thread:$0]  %s41_s15, 32, %s124_s2, [#allocation4]  }
  0x18   :  { %94 = dma.done.wait [#allocation4], 32  }
  0x19   :  { %95 = vsyncadd [#allocation4], 4294967264 }
  0x1a   :  { %47 = vsyncpa [#allocation3], 1 }
  0x1b   :  { %48 = vsyncpa [#allocation4], 1 }

</bundles_post_ra>
